<compile_context>
chip_gen: v7x
topology: tpu7x:2x2x1
jax: 0.10.0
libtpu: 0.0.40
codegen_flags: <defaults>
</compile_context>

<pallas_src>
import functools

import jax
import jax.numpy as jnp
from jax.experimental import pallas as pl
from jax.experimental.pallas import tpu as pltpu


def _round_up(x: int, m: int) -> int:
    return ((x + m - 1) // m) * m


def _make_iou_loss_kernel(eps: float, mode: str, n: int, tile_rows: int,
                          tiles_per_core: int):
    """Kernel over one (tile_rows, 128) block of interleaved box coordinates.

    pred/target keep their natural (N, 4) row-major layout, viewed as
    (rows, 128): lane l of row r holds coordinate (l % 4) of box 32*r + l//4,
    i.e. lanes repeat [x1, y1, x2, y2].  Per-box results live on the x1 lanes
    (lane % 4 == 0); the other lanes carry garbage and are masked.
    """
    tile_elems = tile_rows * 128

    def kernel(p_ref, t_ref, out_ref, acc_ref):
        c = pl.program_id(0)          # TensorCore split ("parallel")
        j = pl.program_id(1)          # reduction step   ("arbitrary")

        @pl.when(j == 0)
        def _init():
            acc_ref[...] = jnp.zeros_like(acc_ref)

        p = p_ref[...]                # (tile_rows, 128) f32, interleaved
        t = t_ref[...]

        lane = jax.lax.broadcasted_iota(jnp.int32, p.shape, 1)
        lane_mod4 = lane & 3
        is_lo = lane_mod4 < 2         # x1/y1 lanes of each 4-lane group

        # Intersection box: lt = max(p, t) on x1/y1 lanes, rb = min on x2/y2.
        m = jnp.where(is_lo, jnp.maximum(p, t), jnp.minimum(p, t))

        # shl_k(a)[l] == a[l + k]  (np.roll semantics: shift = 128 - k).
        def shl2(a):
            return pltpu.roll(a, 126, axis=1)

        def shl1(a):
            return pltpu.roll(a, 127, axis=1)

        wh_i = jnp.maximum(shl2(m) - m, 0.0)   # lane 4k: inter w, 4k+1: inter h
        wh_p = shl2(p) - p                     # pred  w / h
        wh_t = shl2(t) - t                     # target w / h

        def pair_prod(a):                      # lane 4k: a[4k] * a[4k+1]
            return a * shl1(a)

        overlap = pair_prod(wh_i)
        area_p = pair_prod(wh_p)
        area_t = pair_prod(wh_t)

        union = jnp.maximum(area_p + area_t - overlap, eps)
        ious = jnp.maximum(overlap / union, eps)          # .clamp(min=eps)

        # Valid lanes: x1 lanes whose global element index is < 4*n.  Covers
        # padded boxes, the ragged last tile (garbage VMEM past the array end)
        # and the phantom tile of the 2-core split.  Invalid lanes get iou = 1
        # -> loss exactly 0 in all three modes (also kills any NaN from
        # garbage data, since where() is a select).
        g = c * tiles_per_core + j                        # global tile index
        row = jax.lax.broadcasted_iota(jnp.int32, p.shape, 0)
        flat = row * 128 + lane                           # element idx in tile
        limit = 4 * n - g * tile_elems
        valid = (lane_mod4 == 0) & (flat < limit)
        ious = jnp.where(valid, ious, 1.0)

        if mode == 'linear':
            loss = 1.0 - ious
        elif mode == 'square':
            loss = 1.0 - ious * ious
        else:                                             # 'log'
            loss = -jnp.log(ious)

        # Vector accumulate: sublane-group reduce = pure VALU vreg adds.  The
        # single cross-lane/sublane reduction happens only in the finalize.
        acc_ref[...] += loss.reshape(tile_rows // 8, 8, 128).sum(axis=0)

        @pl.when(j == pl.num_programs(1) - 1)
        def _finalize():
            part = jnp.sum(acc_ref[...])                  # per-core partial sum
            out_ref[...] = jnp.broadcast_to(part, (1, 128))

    return kernel


@functools.partial(jax.jit,
                   static_argnames=("eps", "loss_weight", "mode", "tile_rows"))
def iou_loss_tpu(pred, target, *, eps=1e-6, loss_weight=1.0, mode='log',
                 tile_rows=8192):
    """pred, target: (N, 4) float32 boxes in (x1, y1, x2, y2) format.
    Returns scalar loss_weight * mean(loss(mode)) — module defaults
    (reduction='mean', weight=None, avg_factor=None)."""
    assert pred.shape == target.shape and pred.ndim == 2 and pred.shape[-1] == 4
    assert mode in ('linear', 'square', 'log')
    n = pred.shape[0]
    if n == 0:
        # torch .mean() over an empty tensor is NaN; keep that behaviour.
        return jnp.array(jnp.nan, jnp.float32)

    p = pred.astype(jnp.float32)
    t = target.astype(jnp.float32)

    # No repack / transpose: row-major (N, 4) -> (N/32, 128) is a free,
    # layout-preserving reshape (the kernel handles the lane interleave).
    n32 = _round_up(n, 32)
    if n32 != n:
        # TODO(synk): for large ragged N this pad is one extra full-array copy;
        # the padded boxes are masked to zero loss inside the kernel.
        p = jnp.pad(p, ((0, n32 - n), (0, 0)))
        t = jnp.pad(t, ((0, n32 - n), (0, 0)))
    rows = n32 // 32
    p = p.reshape(rows, 128)
    t = t.reshape(rows, 128)
    if rows < 8:                       # tiny inputs: round up to one full vreg
        p = jnp.pad(p, ((0, 8 - rows), (0, 0)))
        t = jnp.pad(t, ((0, 8 - rows), (0, 0)))
        rows = 8

    tile_rows = max(8, (int(tile_rows) // 8) * 8)
    tr = min(tile_rows, (rows // 8) * 8)       # multiple of 8, <= rows
    total_tiles = -(-rows // tr)               # ceil; last tile may be ragged
    tiles_per_core = -(-total_tiles // 2)      # 2-way split (v7x megacore)
    grid = (2, tiles_per_core)

    def in_map(c, j):
        g = c * tiles_per_core + j
        # Clamp the phantom tile of the second core when total_tiles is odd;
        # its contribution is fully masked inside the kernel.
        return (jnp.minimum(g, total_tiles - 1), 0)

    kernel = _make_iou_loss_kernel(eps, mode, n, tr, tiles_per_core)

    out = pl.pallas_call(
        kernel,
        out_shape=jax.ShapeDtypeStruct((1, 2 * 128), jnp.float32),
        grid_spec=pltpu.PrefetchScalarGridSpec(
            num_scalar_prefetch=0,
            grid=grid,
            in_specs=[pl.BlockSpec((tr, 128), in_map),
                      pl.BlockSpec((tr, 128), in_map)],
            out_specs=pl.BlockSpec((1, 128), lambda c, j: (0, c)),
            scratch_shapes=[pltpu.VMEM((8, 128), jnp.float32)],
        ),
        compiler_params=pltpu.CompilerParams(
            dimension_semantics=("parallel", "arbitrary"),
            vmem_limit_bytes=32 * 1024 * 1024,
        ),
        cost_estimate=pl.CostEstimate(
            flops=25 * 4 * n32,
            transcendentals=(4 * n32 if mode == 'log' else 0),
            bytes_accessed=2 * 16 * n32 + 1024,
        ),
    )(p, t)

    total = out[0, 0] + out[0, 128]            # combine per-core partial sums
    return (loss_weight / n) * total


def _reference_iou_loss(pred, target, eps=1e-6, loss_weight=1.0, mode='log'):
    # Pure-JAX reference matching the PyTorch module (reduction='mean').
    pred = pred.astype(jnp.float32)
    target = target.astype(jnp.float32)
    lt = jnp.maximum(pred[:, :2], target[:, :2])
    rb = jnp.minimum(pred[:, 2:], target[:, 2:])
    wh = jnp.maximum(rb - lt, 0.0)
    overlap = wh[:, 0] * wh[:, 1]
    ap = (pred[:, 2] - pred[:, 0]) * (pred[:, 3] - pred[:, 1])
    at = (target[:, 2] - target[:, 0]) * (target[:, 3] - target[:, 1])
    union = jnp.maximum(ap + at - overlap, eps)
    ious = jnp.maximum(overlap / union, eps)
    if mode == 'linear':
        loss = 1.0 - ious
    elif mode == 'square':
        loss = 1.0 - ious * ious
    else:
        loss = -jnp.log(ious)
    return loss_weight * jnp.mean(loss)


def _make_boxes(key, n):
    k1, k2, k3, k4 = jax.random.split(key, 4)
    xy1_p = jax.random.uniform(k1, (n, 2), jnp.float32, 0.0, 10.0)
    wh_p = jax.random.uniform(k2, (n, 2), jnp.float32, 1.0, 6.0)
    pred = jnp.concatenate([xy1_p, xy1_p + wh_p], axis=-1)          # (n, 4)

    jitter = jax.random.uniform(k3, (n, 2), jnp.float32, -1.0, 1.0)
    wh_t = jax.random.uniform(k4, (n, 2), jnp.float32, 1.0, 6.0)
    xy1_t = xy1_p + jitter
    target = jnp.concatenate([xy1_t, xy1_t + wh_t], axis=-1)        # (n, 4)
    return pred, target


if __name__ == "__main__":
    # IoULoss has no learnable parameters — only config (mode='log', eps=1e-6,
    # reduction='mean', loss_weight=1.0).
    key = jax.random.PRNGKey(0)
    k1, k2, k3 = jax.random.split(key, 3)

    # small case (N=8): single tile, heavy masking (pad 8->32 boxes, 1->8 rows)
    pred_s, target_s = _make_boxes(k1, 8)
    got_s = jax.block_until_ready(
        iou_loss_tpu(pred_s, target_s, eps=1e-6, loss_weight=1.0, mode='log'))
    ref_s = _reference_iou_loss(pred_s, target_s)
    assert jnp.allclose(got_s, ref_s, rtol=1e-5, atol=1e-5), (got_s, ref_s)

    # multi-tile ragged case (N=300, tile_rows=8): both cores get real tiles,
    # ragged last tile + padded boxes exercised.
    pred_m, target_m = _make_boxes(k2, 300)
    got_m = jax.block_until_ready(
        iou_loss_tpu(pred_m, target_m, eps=1e-6, loss_weight=1.0, mode='log',
                     tile_rows=8))
    ref_m = _reference_iou_loss(pred_m, target_m)
    assert jnp.allclose(got_m, ref_m, rtol=1e-5, atol=1e-5), (got_m, ref_m)

    # aligned multi-row tiles (N=1024, tile_rows=16), 'linear' mode.
    pred_l, target_l = _make_boxes(k3, 1024)
    got_l = jax.block_until_ready(
        iou_loss_tpu(pred_l, target_l, eps=1e-6, loss_weight=1.0,
                     mode='linear', tile_rows=16))
    ref_l = _reference_iou_loss(pred_l, target_l, mode='linear')
    assert jnp.allclose(got_l, ref_l, rtol=1e-5, atol=1e-5), (got_l, ref_l)

    print("KERNEL_OK")
</pallas_src>

<mosaic_0001>
module attributes {stable_mosaic.version = 11 : i64} {
  func.func @kernel(%arg0: i32, %arg1: i32, %arg2: memref<8x128xf32, #tpu.memory_space<vmem>>, %arg3: memref<8x128xf32, #tpu.memory_space<vmem>>, %arg4: memref<1x128xf32, #tpu.memory_space<vmem>>, %arg5: memref<8x128xf32, #tpu.memory_space<vmem>>) attributes {dimension_semantics = [#tpu.dimension_semantics<parallel>, #tpu.dimension_semantics<arbitrary>], iteration_bounds = array<i64: 2, 1>, scalar_prefetch = 0 : i64, scratch_operands = 1 : i64, tpu.core_type = #tpu.core_type<tc>, window_params = [{transform_indices = @transform_0, window_bounds = array<i64: 8, 128>}, {transform_indices = @transform_1, window_bounds = array<i64: 8, 128>}, {transform_indices = @transform_2, window_bounds = array<i64: 1, 128>}]} {
    %c0_i32 = arith.constant 0 : i32
    %0 = arith.cmpi eq, %arg1, %c0_i32 : i32
    %1 = arith.extui %0 : i1 to i32
    %c0_i32_0 = arith.constant 0 : i32
    %2 = arith.cmpi ne, %1, %c0_i32_0 : i32
    scf.if %2 {
      %cst_20 = arith.constant 0.000000e+00 : f32
      %60 = vector.broadcast %cst_20 : f32 to vector<8x128xf32>
      %c0_21 = arith.constant 0 : index
      %c0_22 = arith.constant 0 : index
      %61 = vector.load %arg5[%c0_21, %c0_22] : memref<8x128xf32, #tpu.memory_space<vmem>>, vector<8x128xf32>
      tpu.vector_store %arg5[%c0_21, %c0_22], %60 {strides = array<i32>} : memref<8x128xf32, #tpu.memory_space<vmem>>, vector<8x128xf32>,
    } else {
    }
    %c0 = arith.constant 0 : index
    %c0_1 = arith.constant 0 : index
    %3 = vector.load %arg2[%c0, %c0_1] : memref<8x128xf32, #tpu.memory_space<vmem>>, vector<8x128xf32>
    %c0_2 = arith.constant 0 : index
    %c0_3 = arith.constant 0 : index
    %4 = vector.load %arg3[%c0_2, %c0_3] : memref<8x128xf32, #tpu.memory_space<vmem>>, vector<8x128xf32>
    %5 = tpu.iota {dimensions = array<i32: 1>} : vector<8x128xi32>
    %c3_i32 = arith.constant 3 : i32
    %6 = vector.broadcast %c3_i32 : i32 to vector<8x128xi32>
    %7 = arith.andi %5, %6 : vector<8x128xi32>
    %c2_i32 = arith.constant 2 : i32
    %8 = vector.broadcast %c2_i32 : i32 to vector<8x128xi32>
    %9 = arith.cmpi slt, %7, %8 : vector<8x128xi32>
    %10 = arith.maximumf %3, %4 : vector<8x128xf32>
    %11 = arith.minimumf %3, %4 : vector<8x128xf32>
    %12 = arith.select %9, %10, %11 : vector<8x128xi1>, vector<8x128xf32>
    %c126_i32 = arith.constant 126 : i32
    %13 = tpu.dynamic_rotate %12 by %c126_i32 dim 1 : vector<8x128xf32>, i32 -> vector<8x128xf32>
    %14 = arith.subf %13, %12 : vector<8x128xf32>
    %cst = arith.constant 0.000000e+00 : f32
    %15 = vector.broadcast %cst : f32 to vector<8x128xf32>
    %16 = arith.maximumf %14, %15 : vector<8x128xf32>
    %c126_i32_4 = arith.constant 126 : i32
    %17 = tpu.dynamic_rotate %3 by %c126_i32_4 dim 1 : vector<8x128xf32>, i32 -> vector<8x128xf32>
    %18 = arith.subf %17, %3 : vector<8x128xf32>
    %c126_i32_5 = arith.constant 126 : i32
    %19 = tpu.dynamic_rotate %4 by %c126_i32_5 dim 1 : vector<8x128xf32>, i32 -> vector<8x128xf32>
    %20 = arith.subf %19, %4 : vector<8x128xf32>
    %c127_i32 = arith.constant 127 : i32
    %21 = tpu.dynamic_rotate %16 by %c127_i32 dim 1 : vector<8x128xf32>, i32 -> vector<8x128xf32>
    %22 = arith.mulf %16, %21 : vector<8x128xf32>
    %c127_i32_6 = arith.constant 127 : i32
    %23 = tpu.dynamic_rotate %18 by %c127_i32_6 dim 1 : vector<8x128xf32>, i32 -> vector<8x128xf32>
    %24 = arith.mulf %18, %23 : vector<8x128xf32>
    %c127_i32_7 = arith.constant 127 : i32
    %25 = tpu.dynamic_rotate %20 by %c127_i32_7 dim 1 : vector<8x128xf32>, i32 -> vector<8x128xf32>
    %26 = arith.mulf %20, %25 : vector<8x128xf32>
    %27 = arith.addf %24, %26 : vector<8x128xf32>
    %28 = arith.subf %27, %22 : vector<8x128xf32>
    %cst_8 = arith.constant 9.99999997E-7 : f32
    %29 = vector.broadcast %cst_8 : f32 to vector<8x128xf32>
    %30 = arith.maximumf %28, %29 : vector<8x128xf32>
    %31 = arith.divf %22, %30 : vector<8x128xf32>
    %cst_9 = arith.constant 9.99999997E-7 : f32
    %32 = vector.broadcast %cst_9 : f32 to vector<8x128xf32>
    %33 = arith.maximumf %31, %32 : vector<8x128xf32>
    %c1_i32 = arith.constant 1 : i32
    %34 = arith.muli %arg0, %c1_i32 : i32
    %35 = arith.addi %34, %arg1 : i32
    %36 = tpu.iota {dimensions = array<i32: 0>} : vector<8x128xi32>
    %c128_i32 = arith.constant 128 : i32
    %37 = vector.broadcast %c128_i32 : i32 to vector<8x128xi32>
    %38 = arith.muli %36, %37 : vector<8x128xi32>
    %39 = arith.addi %38, %5 : vector<8x128xi32>
    %c1024_i32 = arith.constant 1024 : i32
    %40 = arith.muli %35, %c1024_i32 : i32
    %c32_i32 = arith.constant 32 : i32
    %41 = arith.subi %c32_i32, %40 : i32
    %c0_i32_10 = arith.constant 0 : i32
    %42 = vector.broadcast %c0_i32_10 : i32 to vector<8x128xi32>
    %43 = arith.cmpi eq, %7, %42 : vector<8x128xi32>
    %44 = vector.broadcast %41 : i32 to vector<8x128xi32>
    %45 = arith.cmpi slt, %39, %44 : vector<8x128xi32>
    %46 = arith.andi %43, %45 : vector<8x128xi1>
    %cst_11 = arith.constant 1.000000e+00 : f32
    %47 = vector.broadcast %cst_11 : f32 to vector<8x128xf32>
    %48 = arith.select %46, %33, %47 : vector<8x128xi1>, vector<8x128xf32>
    %49 = math.log %48 : vector<8x128xf32>
    %cst_12 = arith.constant 0.000000e+00 : f32
    %50 = vector.broadcast %cst_12 : f32 to vector<8x128xf32>
    %51 = arith.subf %50, %49 : vector<8x128xf32>
    %c0_13 = arith.constant 0 : index
    %c0_14 = arith.constant 0 : index
    %52 = vector.load %arg5[%c0_13, %c0_14] : memref<8x128xf32, #tpu.memory_space<vmem>>, vector<8x128xf32>
    %53 = vector.shape_cast %51 : vector<8x128xf32> to vector<1x8x128xf32>
    %cst_15 = arith.constant dense<0.000000e+00> : vector<8x128xf32>
    %54 = vector.multi_reduction <add>, %53, %cst_15 [0] : vector<1x8x128xf32> to vector<8x128xf32>
    %55 = arith.addf %52, %54 : vector<8x128xf32>
    %c0_16 = arith.constant 0 : index
    %c0_17 = arith.constant 0 : index
    %56 = vector.load %arg5[%c0_16, %c0_17] : memref<8x128xf32, #tpu.memory_space<vmem>>, vector<8x128xf32>
    tpu.vector_store %arg5[%c0_16, %c0_17], %55 {strides = array<i32>} : memref<8x128xf32, #tpu.memory_space<vmem>>, vector<8x128xf32>,
    %c0_i32_18 = arith.constant 0 : i32
    %57 = arith.cmpi eq, %arg1, %c0_i32_18 : i32
    %58 = arith.extui %57 : i1 to i32
    %c0_i32_19 = arith.constant 0 : i32
    %59 = arith.cmpi ne, %58, %c0_i32_19 : i32
    scf.if %59 {
      %c0_20 = arith.constant 0 : index
      %c0_21 = arith.constant 0 : index
      %60 = vector.load %arg5[%c0_20, %c0_21] : memref<8x128xf32, #tpu.memory_space<vmem>>, vector<8x128xf32>
      %61 = vector.shape_cast %60 : vector<8x128xf32> to vector<1x8x128xf32>
      %cst_22 = arith.constant dense<0.000000e+00> : vector<1xf32>
      %62 = vector.multi_reduction <add>, %61, %cst_22 [1, 2] : vector<1x8x128xf32> to vector<1xf32>
      %63 = vector.shape_cast %62 : vector<1xf32> to vector<1x1x1xf32>
      %64 = vector.extract %63[0, 0, 0] : f32 from vector<1x1x1xf32>
      %65 = vector.broadcast %64 : f32 to vector<1x128xf32>
      %c0_23 = arith.constant 0 : index
      %c0_24 = arith.constant 0 : index
      %66 = vector.load %arg4[%c0_23, %c0_24] : memref<1x128xf32, #tpu.memory_space<vmem>>, vector<1x128xf32>
      tpu.vector_store %arg4[%c0_23, %c0_24], %65 {strides = array<i32>} : memref<1x128xf32, #tpu.memory_space<vmem>>, vector<1x128xf32>,
    } else {
    }
    return
  }
  func.func @transform_0(%arg0: i32, %arg1: i32) -> (i32, i32) {
    %c1_i32 = arith.constant 1 : i32
    %0 = arith.muli %arg0, %c1_i32 : i32
    %1 = arith.addi %0, %arg1 : i32
    %c0_i32 = arith.constant 0 : i32
    %2 = arith.minsi %1, %c0_i32 : i32
    %c0_i32_0 = arith.constant 0 : i32
    %c0_i32_1 = arith.constant 0 : i32
    return %2, %c0_i32_0 : i32, i32
  }
  func.func @transform_1(%arg0: i32, %arg1: i32) -> (i32, i32) {
    %c1_i32 = arith.constant 1 : i32
    %0 = arith.muli %arg0, %c1_i32 : i32
    %1 = arith.addi %0, %arg1 : i32
    %c0_i32 = arith.constant 0 : i32
    %2 = arith.minsi %1, %c0_i32 : i32
    %c0_i32_0 = arith.constant 0 : i32
    %c0_i32_1 = arith.constant 0 : i32
    return %2, %c0_i32_0 : i32, i32
  }
  func.func @transform_2(%arg0: i32, %arg1: i32) -> (i32, i32) {
    %c0_i32 = arith.constant 0 : i32
    %c0_i32_0 = arith.constant 0 : i32
    return %c0_i32, %arg0 : i32, i32
  }
}

</mosaic_0001>

<bundles_post_ra>
// kernel: iou_loss_tpu.1
= control target key start
LH: loop header
LB: loop body
LE: loop exit
PB: predicated region body
PF: predicated region fallthrough
CT: control target
= control target key end

     0   :  { %s437_s9 = smov 0   ;;  %s439_s10 = smov 0   ;;  %s492_s0 = inlined_call_operand.vmem [shape: f32[8,128], index: 0, kind: input, shape index: {}]   ;;  %s493_s1 = inlined_call_operand.vmem [shape: f32[8,128], index: 1, kind: input, shape index: {}]   ;;  %s494_s2 = inlined_call_operand.vmem [shape: f32[1,256], index: 2, kind: output, shape index: {}]  }
   0x1   :  { %s441_s11 = smov 0  }
   0x2 LB: > { %s24_s12 = sadd.s32 1, %s414_s10  ;;  %p352_p0 = scmp.ge.s32.totalorder %s418_s11, 1  ;;  %s418_s11 = sphi %s441_s11, %s12_s11   ;;  %s414_s10 = sphi %s439_s10, %s500_s10   ;;  %s410_s9 = sphi %s437_s9, %s499_s9  }
   0x3   : > { %p26_p1 = scmp.ge.s32.totalorder %s24_s12, 2  ;;  %p156_p2 = scmp.lt.s32.totalorder %s418_s11, 3 }
   0x5   : > { %s502_s12 = smov (%p26_p1, %s24_s12), 0  ;;  %p157_p3 = pnand %p352_p0, %p156_p2 }
   0x6   : > { %p186_p4 = scmp.lt.s32.totalorder (!%p157_p3), %s410_s9, 0  ;;  %v215_v0 = vlaneseq (!%p157_p3)  ;;  %s420_s21 = smov (!%p157_p3), 126  }
   0x7   : > { %160 = sbr.rel (%p157_p3) target bundleno = 507 (0x1fb), region = 28  ;;  %s421_s22 = smov (!%p157_p3), 127  }
   0x8   : > { %v216_v1 = vand.u32 (!%p157_p3), 127, %v215_v0  ;;  %v249_v2 = vshrl.u32 (!%p157_p3), %v215_v0, 7  ;;  %s361_s23 = sshll.u32 (!%p157_p3), %s410_s9, 10  ;;  %p205_p5 = scmp.lt.s32.totalorder (!%p157_p3), %s410_s9, 1 }
   0x9   : > { %s253_s24 = ssub.s32 (!%p157_p3), 32, %s361_s23 }
   0xa   : > { %v217_v3 = vand.u32 (!%p157_p3), 3, %v216_v1  ;;  %v250_v4 = vmul.u32 (!%p157_p3), 128, %v249_v2  ;;  %v255_v19 = vstv (!%p157_p3), %s253_s24 }
   0xc   : > { %v251_v5 = vadd.s32 (!%p157_p3), %v250_v4, %v216_v1  ;;  %vm218_vm0 = vcmp.lt.s32.totalorder (!%p157_p3), %v217_v3, 2  ;;  %vm466_vm1 = vcmp.eq.s32.totalorder (!%p157_p3), %v217_v3, 0 }
   0xe   : > { %s187_s13 = scalar_select %p186_p4, %s410_s9, 0  ;;  %vm470_vm2 = vcmp.lt.s32.totalorder %v251_v5, %v255_v19 }
   0xf   : > { %vm257_vm3 = vmand %vm466_vm1, %vm470_vm2  ;;  %s506_s9 = smov (!%p205_p5, %s410_s9), 1 }
  0x10   : > { %s504_s13 = smov (!%p186_p4, %s187_s13), 0  ;;  %s207_s27 = scalar_lea.vmem %s494_s2, %s506_s9 }
  0x11   : > { %s356_s14 = sshll.u32 %s504_s13, 3 }
  0x12   : > { %s201_s17 = scalar_lea.vmem %s493_s1, %s356_s14  ;;  %s191_s20 = scalar_lea.vmem %s492_s0, %s356_s14 }
  0x13   : > { %v214_v6 = vld [vmem:[%s201_s17] sm:$0xff] }
  0x14   : > { %v213_v7 = vld [vmem:[%s191_s20] sm:$0xff]  ;;  %229 = vrot.lane.b32.xlu1 %v214_v6, %s420_s21 }
  0x15   : > { %v219_v8 = vmax.f32 %v213_v7, %v214_v6  ;;  %v220_v9 = vmin.f32 %v213_v7, %v214_v6 }
  0x17   : > { %v221_v10 = vsel %vm218_vm0, %v219_v8, %v220_v9 }
  0x18   : > { %222 = vrot.lane.b32.xlu0 %v221_v10, %s420_s21 }
  0x1c   : > { %226 = vrot.lane.b32.xlu0 %v213_v7, %s420_s21 }
  0x86   : > { %v230_v11 = vpop.permute.xlu1 %229 }
  0x87   : > { %v231_v12 = vsub.f32 %v230_v11, %v214_v6 }
  0x89   : > { %238 = vrot.lane.b32.xlu0 %v231_v12, %s421_s22 }
  0x8a   : > { %v223_v13 = vpop.permute.xlu0 %222 }
  0x8b   : > { %v224_v15 = vsub.f32 %v223_v13, %v221_v10 }
  0x8d   : > { %v225_v17 = vmax.f32 %v224_v15, 0.0 }
  0x8e   : > { %v227_v14 = vpop.permute.xlu0 %226 }
  0x8f   : > { %v228_v16 = vsub.f32 %v227_v14, %v213_v7 }
  0x91   : > { %235 = vrot.lane.b32.xlu1 %v228_v16, %s421_s22 }
  0x95   : > { %232 = vrot.lane.b32.xlu1 %v225_v17, %s421_s22 }
  0xfb   : > { %v239_v21 = vpop.permute.xlu0 %238 }
  0xfc   : > { %v240_v24 = vmul.f32 %v239_v21, %v231_v12 }
 0x103   : > { %v236_v22 = vpop.permute.xlu1 %235 }
 0x104   : > { %v237_v23 = vmul.f32 %v236_v22, %v228_v16 }
 0x106   : > { %v241_v26 = vadd.f32 %v240_v24, %v237_v23 }
 0x107   : > { %v233_v25 = vpop.permute.xlu1 %232 }
 0x108   : > { %v234_v27 = vmul.f32 %v233_v25, %v225_v17 }
 0x10a   : > { %v242_v28 = vsub.f32 %v241_v26, %v234_v27 }
 0x10c   : > { %v243_v29 = vmax.f32 %v242_v28, 1e-06 }
 0x10e   : > { %392 = vrcp.f32 %v243_v29 }
 0x118   : > { %v393_v30 = vpop.eup %392 }
 0x119   : > { %v245_v31 = vmul.f32 %v393_v30, %v234_v27 }
 0x11b   : > { %v246_v32 = vmax.f32 %v245_v31, 1e-06 }
 0x11d   : > { %v258_v33 = vsel %vm257_vm3, %v246_v32, 1.0 }
 0x11e   : > { %394 = vlog2.f32 %v258_v33 }
 0x128   : > { %v395_v34 = vpop.eup %394 }
 0x129   : > { %v260_v35 = vmul.f32 0.6931472, %v395_v34 }
 0x12b   : > { %v261_v36 = vsub.f32 0.0, %v260_v35 }
 0x12d   : > { %270 = vadd.xlane.f32.xlu0 %v261_v36 }
 0x1ba   : > { %v271_v37 = vpop.xlane.xlu0 %270 }
 0x1bb   : > { %v272_v38 = vrot.slane %v271_v37, 4 }
 0x1bd   : > { %v273_v39 = vadd.f32 %v272_v38, %v271_v37 }
 0x1bf   : > { %v274_v40 = vrot.slane %v273_v39, 2 }
 0x1c1   : > { %v275_v41 = vadd.f32 %v274_v40, %v273_v39 }
 0x1c3   : > { %v276_v42 = vrot.slane %v275_v41, 1 }
 0x1c5   : > { %v277_v43 = vadd.f32 %v276_v42, %v275_v41 }
 0x1c7   : > { %364 = vpush %v277_v43 }
 0x1f8   : > { %s365_s28 = spop %364 }
 0x1f9   : > { %v279_v44 = vstv %s365_s28 }
 0x1fa   : > { %280 = vst [vmem:[%s207_s27] sm:$0x1] %v279_v44 }
 0x1fb PF: > { %s12_s11 = sadd.s32 1, %s418_s11   ;;  %s499_s9 = smov %s414_s10 }
 0x1fc   : > { %p9_p6 = scmp.ge.s32.totalorder %s12_s11, 4   ;;  %s500_s10 = smov %s502_s12 }
 0x1fe   :  { %11 = sbr.rel (!%p9_p6) target bundleno = 2 (0x2), region = 69 }

</bundles_post_ra>
